<compile_context>
chip_gen: v5e
topology: v5e:2x2
jax: 0.10.0
libtpu: 0.0.40
codegen_flags: <defaults>
</compile_context>

<pallas_src>
import functools

import jax
import jax.numpy as jnp
from jax.experimental import pallas as pl
from jax.experimental.pallas import tpu as pltpu

HIDDEN = 512
LN_EPS = 1e-5
_TB_MAX = 512      # max batch tile (multiple of 256 -> good for v5e/v6e/v7x MXU)
_DK_MAX = 2048     # max feature (K) tile, multiple of 128


def _round_up(x, m):
    return (x + m - 1) // m * m


def _pick_tiles(B, D):
    """Pick (batch_tile, feature_tile)."""
    tb = _TB_MAX if B > _TB_MAX else _round_up(max(B, 1), 8)
    dk = D if D <= _DK_MAX else _DK_MAX
    return tb, dk


def _decoder_kernel(x_ref, w1_ref, b1_ref, g_ref, beta_ref, w2t_ref, b2t_ref,
                    out_ref, acc_ref, *, max_sigma, min_sigma):
    k = pl.program_id(1)

    @pl.when(k == 0)
    def _():
        acc_ref[...] = jnp.zeros_like(acc_ref)

    # Linear 1, K-tiled: (tb, dk)bf16 @ (dk, 512)bf16 -> f32 accumulator.
    acc_ref[...] += jnp.dot(x_ref[...], w1_ref[...],
                            preferred_element_type=jnp.float32)

    @pl.when(k == pl.num_programs(1) - 1)
    def _():
        h = acc_ref[...] + b1_ref[...]

        # LayerNorm over the lane axis; single-pass variance.
        mean = jnp.mean(h, axis=-1, keepdims=True)
        mean2 = jnp.mean(h * h, axis=-1, keepdims=True)
        var = jnp.maximum(mean2 - mean * mean, 0.0)
        hn = (h - mean) * jax.lax.rsqrt(var + LN_EPS)
        hn = hn * g_ref[...] + beta_ref[...]

        hr = jnp.maximum(hn, 0.0)   # ReLU

        # Linear 2, transposed so the batch lands on the 128-lane axis:
        #   (2, 512) . (tb, 512)^T -> (2, tb)
        y_t = jax.lax.dot_general(
            w2t_ref[...], hr,
            dimension_numbers=(((1,), (1,)), ((), ())),
            preferred_element_type=jnp.float32) + b2t_ref[...]

        # Row 0 = mu, row 1 = sigma (sigmoid + affine); one lane-dense store.
        sig = min_sigma + (max_sigma - min_sigma) * jax.nn.sigmoid(y_t)
        row = jax.lax.broadcasted_iota(jnp.int32, y_t.shape, 0)
        out_ref[...] = jnp.where(row == 1, sig, y_t)


def state_reward_decoder(x, params, *, max_sigma=1.0, min_sigma=1e-4,
                         tb=None, dk=None):
    """x: (B, D) float32. Returns (mu, sigma), each (B, 1) float32."""
    B, D = x.shape
    w1, b1, g, beta, w2, b2 = params

    tb0, dk0 = _pick_tiles(B, D)
    tb = tb or tb0
    dk = dk or dk0
    B_pad = _round_up(B, tb)
    D_pad = _round_up(D, dk)

    # bf16 inputs to the first matmul (accumulation stays f32 in-kernel).
    x_bf = x.astype(jnp.bfloat16)
    w1_bf = jnp.asarray(w1, jnp.bfloat16)
    if B_pad != B or D_pad != D:
        x_bf = jnp.pad(x_bf, ((0, B_pad - B), (0, D_pad - D)))
    if D_pad != D:
        w1_bf = jnp.pad(w1_bf, ((0, D_pad - D), (0, 0)))

    b1 = jnp.asarray(b1, jnp.float32).reshape(1, HIDDEN)
    g = jnp.asarray(g, jnp.float32).reshape(1, HIDDEN)
    beta = jnp.asarray(beta, jnp.float32).reshape(1, HIDDEN)
    w2t = jnp.asarray(w2, jnp.float32).T                   # (2, 512)
    b2t = jnp.asarray(b2, jnp.float32).reshape(1, 2).T     # (2, 1)

    grid = (B_pad // tb, D_pad // dk)

    kernel = functools.partial(_decoder_kernel,
                               max_sigma=float(max_sigma),
                               min_sigma=float(min_sigma))

    # Rough VMEM budget: double-buffered bf16 x / w1 tiles + f32 scratch and
    # intermediates; keep comfortably under v7x's 64 MiB physical VMEM.
    est = (2 * tb * dk * 2 + 2 * dk * HIDDEN * 2
           + 5 * tb * HIDDEN * 4 + 2 * 2 * tb * 4 + 8 * HIDDEN * 4)
    vmem_limit = int(min(max(2 * est, 32 * 1024 * 1024), 56 * 1024 * 1024))

    out = pl.pallas_call(
        kernel,
        out_shape=jax.ShapeDtypeStruct((2, B_pad), jnp.float32),
        grid_spec=pltpu.PrefetchScalarGridSpec(
            num_scalar_prefetch=0,
            grid=grid,
            in_specs=[
                pl.BlockSpec((tb, dk), lambda i, k: (i, k)),        # x tile
                pl.BlockSpec((dk, HIDDEN), lambda i, k: (k, 0)),    # w1 tile
                pl.BlockSpec((1, HIDDEN), lambda i, k: (0, 0)),     # b1
                pl.BlockSpec((1, HIDDEN), lambda i, k: (0, 0)),     # ln gamma
                pl.BlockSpec((1, HIDDEN), lambda i, k: (0, 0)),     # ln beta
                pl.BlockSpec((2, HIDDEN), lambda i, k: (0, 0)),     # w2^T
                pl.BlockSpec((2, 1), lambda i, k: (0, 0)),          # b2^T
            ],
            out_specs=pl.BlockSpec((2, tb), lambda i, k: (0, i)),   # [mu; sigma]
            scratch_shapes=[pltpu.VMEM((tb, HIDDEN), jnp.float32)],
        ),
        compiler_params=pltpu.CompilerParams(
            dimension_semantics=("parallel", "arbitrary"),
            vmem_limit_bytes=vmem_limit),
    )(x_bf, w1_bf, b1, g, beta, w2t, b2t)

    mu = out[0, :B].reshape(B, 1)
    sigma = out[1, :B].reshape(B, 1)
    return mu, sigma


def init_params(key, encoder_feature_dim):
    """Deterministic synthetic parameters (shapes match nn.Module __init__)."""
    k1, k2 = jax.random.split(key)
    d = encoder_feature_dim
    w1 = jax.random.normal(k1, (d, HIDDEN), jnp.float32) * (1.0 / jnp.sqrt(d))
    b1 = jnp.zeros((1, HIDDEN), jnp.float32)
    gamma = jnp.ones((1, HIDDEN), jnp.float32)
    beta = jnp.zeros((1, HIDDEN), jnp.float32)
    w2 = jax.random.normal(k2, (HIDDEN, 2), jnp.float32) * (1.0 / jnp.sqrt(HIDDEN))
    b2 = jnp.zeros((1, 2), jnp.float32)
    return (w1, b1, gamma, beta, w2, b2)


def _reference(x, params, max_sigma=1.0, min_sigma=1e-4):
    w1, b1, g, beta, w2, b2 = params
    h = x @ w1 + b1
    mean = h.mean(-1, keepdims=True)
    var = ((h - mean) ** 2).mean(-1, keepdims=True)
    hn = (h - mean) / jnp.sqrt(var + LN_EPS) * g + beta
    y = jnp.maximum(hn, 0.0) @ w2 + b2
    mu = y[:, 0:1]
    sigma = min_sigma + (max_sigma - min_sigma) * jax.nn.sigmoid(y[:, 1:2])
    return mu, sigma


if __name__ == "__main__":
    key = jax.random.PRNGKey(0)
    k_x, k_p, k_x2, k_p2 = jax.random.split(key, 4)

    # Small case: batch=8, encoder_feature_dim=32 (single grid step).
    B, D = 8, 32
    x = jax.random.normal(k_x, (B, D), jnp.float32)
    params = init_params(k_p, D)
    mu, sigma = state_reward_decoder(x, params)
    mu, sigma = jax.block_until_ready((mu, sigma))
    mu_ref, sigma_ref = _reference(x, params)
    assert mu.shape == (B, 1) and sigma.shape == (B, 1)
    assert jnp.allclose(mu, mu_ref, atol=5e-2, rtol=5e-2)
    assert jnp.allclose(sigma, sigma_ref, atol=5e-2, rtol=5e-2)

    # Tiled path: batch padding + multi-step batch/K grid (small explicit tiles).
    B2, D2 = 300, 384
    x2 = jax.random.normal(k_x2, (B2, D2), jnp.float32)
    params2 = init_params(k_p2, D2)
    mu2, sigma2 = state_reward_decoder(x2, params2, tb=128, dk=128)
    mu2, sigma2 = jax.block_until_ready((mu2, sigma2))
    mu2_ref, sigma2_ref = _reference(x2, params2)
    assert mu2.shape == (B2, 1) and sigma2.shape == (B2, 1)
    assert jnp.allclose(mu2, mu2_ref, atol=5e-2, rtol=5e-2)
    assert jnp.allclose(sigma2, sigma2_ref, atol=5e-2, rtol=5e-2)

    print("KERNEL_OK")
</pallas_src>

<mosaic_0001>
module attributes {stable_mosaic.version = 11 : i64} {
  func.func @_decoder_kernel(%arg0: i32, %arg1: i32, %arg2: memref<8x32xbf16, #tpu.memory_space<vmem>>, %arg3: memref<32x512xbf16, #tpu.memory_space<vmem>>, %arg4: memref<1x512xf32, #tpu.memory_space<vmem>>, %arg5: memref<1x512xf32, #tpu.memory_space<vmem>>, %arg6: memref<1x512xf32, #tpu.memory_space<vmem>>, %arg7: memref<2x512xf32, #tpu.memory_space<vmem>>, %arg8: memref<2x1xf32, #tpu.memory_space<vmem>>, %arg9: memref<2x8xf32, #tpu.memory_space<vmem>>, %arg10: memref<8x512xf32, #tpu.memory_space<vmem>>) attributes {dimension_semantics = [#tpu.dimension_semantics<parallel>, #tpu.dimension_semantics<arbitrary>], iteration_bounds = array<i64: 1, 1>, scalar_prefetch = 0 : i64, scratch_operands = 1 : i64, tpu.core_type = #tpu.core_type<tc>, window_params = [{transform_indices = @transform_0, window_bounds = array<i64: 8, 32>}, {transform_indices = @transform_1, window_bounds = array<i64: 32, 512>}, {pipeline_mode = #tpu.pipeline_mode<synchronous>, transform_indices = @transform_2, window_bounds = array<i64: 1, 512>}, {pipeline_mode = #tpu.pipeline_mode<synchronous>, transform_indices = @transform_3, window_bounds = array<i64: 1, 512>}, {pipeline_mode = #tpu.pipeline_mode<synchronous>, transform_indices = @transform_4, window_bounds = array<i64: 1, 512>}, {pipeline_mode = #tpu.pipeline_mode<synchronous>, transform_indices = @transform_5, window_bounds = array<i64: 2, 512>}, {pipeline_mode = #tpu.pipeline_mode<synchronous>, transform_indices = @transform_6, window_bounds = array<i64: 2, 1>}, {transform_indices = @transform_7, window_bounds = array<i64: 2, 8>}]} {
    %c0_i32 = arith.constant 0 : i32
    %0 = arith.cmpi eq, %arg1, %c0_i32 : i32
    %1 = arith.extui %0 : i1 to i32
    %c0_i32_0 = arith.constant 0 : i32
    %2 = arith.cmpi ne, %1, %c0_i32_0 : i32
    scf.if %2 {
      %cst_10 = arith.constant 0.000000e+00 : f32
      %12 = vector.broadcast %cst_10 : f32 to vector<8x512xf32>
      %c0_11 = arith.constant 0 : index
      %c0_12 = arith.constant 0 : index
      %13 = vector.load %arg10[%c0_11, %c0_12] : memref<8x512xf32, #tpu.memory_space<vmem>>, vector<8x512xf32>
      tpu.vector_store %arg10[%c0_11, %c0_12], %12 {strides = array<i32>} : memref<8x512xf32, #tpu.memory_space<vmem>>, vector<8x512xf32>,
    } else {
    }
    %c0 = arith.constant 0 : index
    %c0_1 = arith.constant 0 : index
    %3 = vector.load %arg10[%c0, %c0_1] : memref<8x512xf32, #tpu.memory_space<vmem>>, vector<8x512xf32>
    %c0_2 = arith.constant 0 : index
    %c0_3 = arith.constant 0 : index
    %4 = vector.load %arg2[%c0_2, %c0_3] : memref<8x32xbf16, #tpu.memory_space<vmem>>, vector<8x32xbf16>
    %c0_4 = arith.constant 0 : index
    %c0_5 = arith.constant 0 : index
    %5 = vector.load %arg3[%c0_4, %c0_5] : memref<32x512xbf16, #tpu.memory_space<vmem>>, vector<32x512xbf16>
    %cst = arith.constant dense<0.000000e+00> : vector<8x512xf32>
    %6 = tpu.matmul %4, %5, %cst {dimension_numbers = #tpu.dot_dimension_numbers<[1], [0], [0], [1], [0, 0, 1, 1], [], []>} : vector<8x32xbf16>, vector<32x512xbf16>, vector<8x512xf32> -> vector<8x512xf32>
    %7 = arith.addf %3, %6 : vector<8x512xf32>
    %c0_6 = arith.constant 0 : index
    %c0_7 = arith.constant 0 : index
    %8 = vector.load %arg10[%c0_6, %c0_7] : memref<8x512xf32, #tpu.memory_space<vmem>>, vector<8x512xf32>
    tpu.vector_store %arg10[%c0_6, %c0_7], %7 {strides = array<i32>} : memref<8x512xf32, #tpu.memory_space<vmem>>, vector<8x512xf32>,
    %c0_i32_8 = arith.constant 0 : i32
    %9 = arith.cmpi eq, %arg1, %c0_i32_8 : i32
    %10 = arith.extui %9 : i1 to i32
    %c0_i32_9 = arith.constant 0 : i32
    %11 = arith.cmpi ne, %10, %c0_i32_9 : i32
    scf.if %11 {
      %c0_10 = arith.constant 0 : index
      %c0_11 = arith.constant 0 : index
      %12 = vector.load %arg10[%c0_10, %c0_11] : memref<8x512xf32, #tpu.memory_space<vmem>>, vector<8x512xf32>
      %c0_12 = arith.constant 0 : index
      %c0_13 = arith.constant 0 : index
      %13 = vector.load %arg4[%c0_12, %c0_13] : memref<1x512xf32, #tpu.memory_space<vmem>>, vector<1x512xf32>
      %14 = vector.broadcast %13 : vector<1x512xf32> to vector<8x512xf32>
      %15 = arith.addf %12, %14 : vector<8x512xf32>
      %cst_14 = arith.constant dense<0.000000e+00> : vector<8xf32>
      %16 = vector.multi_reduction <add>, %15, %cst_14 [1] : vector<8x512xf32> to vector<8xf32>
      %17 = vector.shape_cast %16 : vector<8xf32> to vector<8x1xf32>
      %cst_15 = arith.constant 5.120000e+02 : f32
      %18 = vector.broadcast %cst_15 : f32 to vector<8x1xf32>
      %19 = arith.divf %17, %18 : vector<8x1xf32>
      %20 = arith.mulf %15, %15 : vector<8x512xf32>
      %cst_16 = arith.constant dense<0.000000e+00> : vector<8xf32>
      %21 = vector.multi_reduction <add>, %20, %cst_16 [1] : vector<8x512xf32> to vector<8xf32>
      %22 = vector.shape_cast %21 : vector<8xf32> to vector<8x1xf32>
      %cst_17 = arith.constant 5.120000e+02 : f32
      %23 = vector.broadcast %cst_17 : f32 to vector<8x1xf32>
      %24 = arith.divf %22, %23 : vector<8x1xf32>
      %25 = arith.mulf %19, %19 : vector<8x1xf32>
      %26 = arith.subf %24, %25 : vector<8x1xf32>
      %cst_18 = arith.constant 0.000000e+00 : f32
      %27 = vector.broadcast %cst_18 : f32 to vector<8x1xf32>
      %28 = arith.maximumf %26, %27 : vector<8x1xf32>
      %29 = vector.broadcast %19 : vector<8x1xf32> to vector<8x512xf32>
      %30 = arith.subf %15, %29 : vector<8x512xf32>
      %cst_19 = arith.constant 9.99999974E-6 : f32
      %31 = vector.broadcast %cst_19 : f32 to vector<8x1xf32>
      %32 = arith.addf %28, %31 : vector<8x1xf32>
      %33 = math.rsqrt %32 : vector<8x1xf32>
      %34 = vector.broadcast %33 : vector<8x1xf32> to vector<8x512xf32>
      %35 = arith.mulf %30, %34 : vector<8x512xf32>
      %c0_20 = arith.constant 0 : index
      %c0_21 = arith.constant 0 : index
      %36 = vector.load %arg5[%c0_20, %c0_21] : memref<1x512xf32, #tpu.memory_space<vmem>>, vector<1x512xf32>
      %37 = vector.broadcast %36 : vector<1x512xf32> to vector<8x512xf32>
      %38 = arith.mulf %35, %37 : vector<8x512xf32>
      %c0_22 = arith.constant 0 : index
      %c0_23 = arith.constant 0 : index
      %39 = vector.load %arg6[%c0_22, %c0_23] : memref<1x512xf32, #tpu.memory_space<vmem>>, vector<1x512xf32>
      %40 = vector.broadcast %39 : vector<1x512xf32> to vector<8x512xf32>
      %41 = arith.addf %38, %40 : vector<8x512xf32>
      %cst_24 = arith.constant 0.000000e+00 : f32
      %42 = vector.broadcast %cst_24 : f32 to vector<8x512xf32>
      %43 = arith.maximumf %41, %42 : vector<8x512xf32>
      %c0_25 = arith.constant 0 : index
      %c0_26 = arith.constant 0 : index
      %44 = vector.load %arg7[%c0_25, %c0_26] : memref<2x512xf32, #tpu.memory_space<vmem>>, vector<2x512xf32>
      %cst_27 = arith.constant dense<0.000000e+00> : vector<2x8xf32>
      %45 = tpu.matmul %44, %43, %cst_27 {dimension_numbers = #tpu.dot_dimension_numbers<[1], [1], [0], [0], [0, 0, 1, 0], [], []>} : vector<2x512xf32>, vector<8x512xf32>, vector<2x8xf32> -> vector<2x8xf32>
      %c0_28 = arith.constant 0 : index
      %c0_29 = arith.constant 0 : index
      %46 = vector.load %arg8[%c0_28, %c0_29] : memref<2x1xf32, #tpu.memory_space<vmem>>, vector<2x1xf32>
      %47 = vector.broadcast %46 : vector<2x1xf32> to vector<2x8xf32>
      %48 = arith.addf %45, %47 : vector<2x8xf32>
      %49 = arith.negf %48 : vector<2x8xf32>
      %50 = math.exp %49 : vector<2x8xf32>
      %cst_30 = arith.constant 1.000000e+00 : f32
      %51 = vector.broadcast %cst_30 : f32 to vector<2x8xf32>
      %52 = arith.addf %51, %50 : vector<2x8xf32>
      %53 = arith.divf %51, %52 : vector<2x8xf32>
      %cst_31 = arith.constant 0.999899983 : f32
      %54 = vector.broadcast %cst_31 : f32 to vector<2x8xf32>
      %55 = arith.mulf %54, %53 : vector<2x8xf32>
      %cst_32 = arith.constant 9.99999974E-5 : f32
      %56 = vector.broadcast %cst_32 : f32 to vector<2x8xf32>
      %57 = arith.addf %56, %55 : vector<2x8xf32>
      %58 = tpu.iota {dimensions = array<i32: 0>} : vector<2x8xi32>
      %c1_i32 = arith.constant 1 : i32
      %59 = vector.broadcast %c1_i32 : i32 to vector<2x8xi32>
      %60 = arith.cmpi eq, %58, %59 : vector<2x8xi32>
      %61 = arith.select %60, %57, %48 : vector<2x8xi1>, vector<2x8xf32>
      %c0_33 = arith.constant 0 : index
      %c0_34 = arith.constant 0 : index
      %62 = vector.load %arg9[%c0_33, %c0_34] : memref<2x8xf32, #tpu.memory_space<vmem>>, vector<2x8xf32>
      tpu.vector_store %arg9[%c0_33, %c0_34], %61 {strides = array<i32>} : memref<2x8xf32, #tpu.memory_space<vmem>>, vector<2x8xf32>,
    } else {
    }
    return
  }
  func.func @transform_0(%arg0: i32, %arg1: i32) -> (i32, i32) {
    %c0_i32 = arith.constant 0 : i32
    return %arg0, %arg1 : i32, i32
  }
  func.func @transform_1(%arg0: i32, %arg1: i32) -> (i32, i32) {
    %c0_i32 = arith.constant 0 : i32
    %c0_i32_0 = arith.constant 0 : i32
    return %arg1, %c0_i32 : i32, i32
  }
  func.func @transform_2(%arg0: i32, %arg1: i32) -> (i32, i32) {
    %c0_i32 = arith.constant 0 : i32
    %c0_i32_0 = arith.constant 0 : i32
    %c0_i32_1 = arith.constant 0 : i32
    return %c0_i32, %c0_i32_0 : i32, i32
  }
  func.func @transform_3(%arg0: i32, %arg1: i32) -> (i32, i32) {
    %c0_i32 = arith.constant 0 : i32
    %c0_i32_0 = arith.constant 0 : i32
    %c0_i32_1 = arith.constant 0 : i32
    return %c0_i32, %c0_i32_0 : i32, i32
  }
  func.func @transform_4(%arg0: i32, %arg1: i32) -> (i32, i32) {
    %c0_i32 = arith.constant 0 : i32
    %c0_i32_0 = arith.constant 0 : i32
    %c0_i32_1 = arith.constant 0 : i32
    return %c0_i32, %c0_i32_0 : i32, i32
  }
  func.func @transform_5(%arg0: i32, %arg1: i32) -> (i32, i32) {
    %c0_i32 = arith.constant 0 : i32
    %c0_i32_0 = arith.constant 0 : i32
    %c0_i32_1 = arith.constant 0 : i32
    return %c0_i32, %c0_i32_0 : i32, i32
  }
  func.func @transform_6(%arg0: i32, %arg1: i32) -> (i32, i32) {
    %c0_i32 = arith.constant 0 : i32
    %c0_i32_0 = arith.constant 0 : i32
    %c0_i32_1 = arith.constant 0 : i32
    return %c0_i32, %c0_i32_0 : i32, i32
  }
  func.func @transform_7(%arg0: i32, %arg1: i32) -> (i32, i32) {
    %c0_i32 = arith.constant 0 : i32
    %c0_i32_0 = arith.constant 0 : i32
    return %c0_i32, %arg0 : i32, i32
  }
}

</mosaic_0001>

<bundles_post_ra>
// kernel: tpu_custom_call.1
= control target key start
LH: loop header
LB: loop body
LE: loop exit
PB: predicated region body
PF: predicated region fallthrough
CT: control target
= control target key end

     0   :  { %12 = vsyncpa [#allocation4], 0  ;;  %s822_s0 = inlined_call_operand.hbm [shape: bf16[8,32], index: 0, kind: input, shape index: {}]   ;;  %s823_s1 = inlined_call_operand.hbm [shape: bf16[32,512], index: 1, kind: input, shape index: {}]   ;;  %s824_s2 = inlined_call_operand.hbm [shape: f32[1,512], index: 2, kind: input, shape index: {}]   ;;  %s825_s3 = inlined_call_operand.hbm [shape: f32[1,512], index: 3, kind: input, shape index: {}]   ;;  %s826_s4 = inlined_call_operand.hbm [shape: f32[1,512], index: 4, kind: input, shape index: {}]   ;;  %s827_s5 = inlined_call_operand.hbm [shape: f32[2,512], index: 5, kind: input, shape index: {}]   ;;  %s828_s6 = inlined_call_operand.vmem [shape: f32[2,1], index: 6, kind: input, shape index: {}]   ;;  %s829_s7 = inlined_call_operand.hbm [shape: f32[2,8], index: 7, kind: output, shape index: {}]  }
   0x1   :  { %13 = vsyncpa [#allocation7], 0 }
   0x2   :  { %14 = vsyncpa [#allocation10], 0 }
   0x3   :  { %15 = vsyncpa [#allocation13], 0  ;;  %s32_s26 = sshll.u32 %s823_s1, 4  ;;  %s33_s26 = int_to_ptr.hbm [resolvable:$true] %s32_s26 }
   0x4   :  { %16 = vsyncpa [#allocation5], 0  ;;  %s723_s27 = smov [#allocation6]   ;;  %s57_s8 = sshll.u32 %s825_s3, 4  ;;  %s58_s8 = int_to_ptr.hbm [resolvable:$true] %s57_s8 }
   0x5   :  { %s34_s28 = sshll.u32 %s723_s27, 4  ;;  %s724_s9 = smov 256   ;;  %s35_s28 = int_to_ptr.vmem [resolvable:$true] %s34_s28 }
   0x6   :  { %s725_s10 = smov 16   ;;  %s726_s11 = smov [#allocation9]  }
   0x7   :  { %40 = dma.hbm_to_vmem [thread:$0]  %s33_s26, 1024, %s35_s28, [#allocation7], %s724_s9, %s724_s9, %s725_s10  }
   0x8   :  { %s59_s12 = sshll.u32 %s726_s11, 4  ;;  %s22_s15 = sshll.u32 %s822_s0, 4  ;;  %s60_s12 = int_to_ptr.vmem [resolvable:$true] %s59_s12  ;;  %s23_s15 = int_to_ptr.hbm [resolvable:$true] %s22_s15 }
   0x9   :  { %62 = dma.hbm_to_vmem [thread:$0]  %s58_s8, 64, %s60_s12, [#allocation10]  }
   0xa   :  { %s46_s17 = sshll.u32 %s824_s2, 4  ;;  %s727_s18 = smov [#allocation3]   ;;  %s47_s17 = int_to_ptr.hbm [resolvable:$true] %s46_s17 }
   0xb   :  { %s24_s19 = sshll.u32 %s727_s18, 4  ;;  %s728_s3 = smov [#allocation8]   ;;  %s25_s19 = int_to_ptr.vmem [resolvable:$true] %s24_s19 }
   0xc   :  { %27 = dma.hbm_to_vmem [thread:$0]  %s23_s15, 64, %s25_s19, [#allocation4]  }
   0xd   :  { %s48_s20 = sshll.u32 %s728_s3, 4  ;;  %s68_s23 = sshll.u32 %s826_s4, 4  ;;  %s49_s20 = int_to_ptr.vmem [resolvable:$true] %s48_s20  ;;  %s69_s23 = int_to_ptr.hbm [resolvable:$true] %s68_s23 }
   0xe   :  { %51 = dma.hbm_to_vmem [thread:$0]  %s47_s17, 64, %s49_s20, [#allocation7]  }
   0xf   :  { %s79_s25 = sshll.u32 %s827_s5, 4  ;;  %s729_s26 = smov [#allocation11]   ;;  %s80_s25 = int_to_ptr.hbm [resolvable:$true] %s79_s25 }
  0x10   :  { %s70_s2 = sshll.u32 %s729_s26, 4  ;;  %s730_s27 = smov [#allocation12]   ;;  %s71_s2 = int_to_ptr.vmem [resolvable:$true] %s70_s2 }
  0x11   :  { %73 = dma.hbm_to_vmem [thread:$0]  %s69_s23, 64, %s71_s2, [#allocation10]  }
  0x12   :  { %s81_s28 = sshll.u32 %s730_s27, 4  ;;  %s82_s28 = int_to_ptr.vmem [resolvable:$true] %s81_s28 }
  0x13   :  { %84 = dma.hbm_to_vmem [thread:$0]  %s80_s25, 128, %s82_s28, [#allocation13]  }
  0x14   :  { %713 = dma.done.wait [#allocation4], 64  }
  0x15   :  { %714 = vsyncadd [#allocation4], 4294967232 }
  0x16   :  { %715 = dma.done.wait [#allocation7], 1088  }
  0x17   :  { %716 = vsyncadd [#allocation7], 4294966208 }
  0x18   :  { %717 = dma.done.wait [#allocation10], 128  }
  0x19   :  { %718 = vsyncadd [#allocation10], 4294967168 }
  0x1a   :  { %719 = dma.done.wait [#allocation13], 128  }
  0x1b   :  { %720 = vsyncadd [#allocation13], 4294967168  ;;  %v497_v0 = vld [vmem:[#allocation6 + $0x20] sm:$0xf]  ;;  %v522_v1 = vld [vmem:[#allocation6 + $0x2c] sm:$0xf0] }
  0x1c   :  { %v520_v2 = vld [vmem:[#allocation6 + $0x24] sm:$0xf]  ;;  %v498_v3 = vor.u32 %v522_v1, %v497_v0  ;;  %v499_v4 = vld [vmem:[#allocation6 + $0x30] sm:$0xf0]  ;;  %v505_v5 = vld [vmem:[#allocation6 + $0x28] sm:$0xf] }
  0x1d   :  { %v523_v6 = vld [vmem:[#allocation6 + $0x34] sm:$0xf0]  ;;  %v502_v7 = vor.u32 %v520_v2, %v499_v4  ;;  %v521_v9 = vld [vmem:[#allocation6 + $0x2c] sm:$0xf]  ;;  %v507_v10 = vld [vmem:[#allocation6 + $0x38] sm:$0xf0] }
  0x1e   :  { %v506_v8 = vor.u32 %v523_v6, %v505_v5  ;;  %v481_v11 = vld [vmem:[#allocation6] sm:$0xf]  ;;  %183 = vmatpush.bf16.msra.mxu0 %v498_v3  ;;  %v510_v12 = vor.u32 %v521_v9, %v507_v10  ;;  %v518_v13 = vld [vmem:[#allocation6 + $0xc] sm:$0xf0]  ;;  %v516_v14 = vld [vmem:[#allocation6 + $0x4] sm:$0xf] }
  0x1f   :  { %v483_v15 = vld [vmem:[#allocation6 + $0x10] sm:$0xf0]  ;;  %196 = vmatpush.bf16.msra.mxu1 %v502_v7  ;;  %v482_v16 = vor.u32 %v518_v13, %v481_v11  ;;  %v489_v18 = vld [vmem:[#allocation6 + $0x8] sm:$0xf]  ;;  %v519_v19 = vld [vmem:[#allocation6 + $0x14] sm:$0xf0] }
  0x20   :  { %209 = vmatpush.bf16.msra.mxu2 %v506_v8  ;;  %v486_v17 = vor.u32 %v516_v14, %v483_v15  ;;  %v517_v20 = vld [vmem:[#allocation6 + $0xc] sm:$0xf]  ;;  %222 = vmatpush.bf16.msra.mxu3 %v510_v12  ;;  %v490_v21 = vor.u32 %v519_v19, %v489_v18  ;;  %v491_v22 = vld [vmem:[#allocation6 + $0x18] sm:$0xf0]  ;;  %vm173_vm0 = vcmask 261120   ;;  %v731_v52 = vmov 512.0  }
  0x21   :  { %v494_v23 = vor.u32 %v517_v20, %v491_v22  ;;  %v124_v24 = vld [vmem:[#allocation3] sm:$0xf]  ;;  %v244_v25 = vld [vmem:[#allocation8] sm:$0xf]  ;;  %537 = vrcp.f32 %v731_v52  ;;  %v335_v61 = vld [vmem:[#allocation12] sm:$0xff]  ;;  %v732_v4 = vmov 0  }
  0x22   :  { %184 = vmatpush.bf16.msra.mxu0 %v482_v16  ;;  %v246_v26 = vperm.slane %v244_v25, 0  ;;  %v247_v27 = vperm.slane %v244_v25, 1  ;;  %v248_v32 = vperm.slane %v244_v25, 2  ;;  %v249_v33 = vperm.slane %v244_v25, 3  ;;  %343 = vst [vmem:[#allocation1] ss:$4 sm:$0xff] %v335_v61  ;;  %535 = vset.pattern.permute.xlu1 %v732_v4 }
  0x23   :  { %197 = vmatpush.bf16.msra.mxu1 %v486_v17  ;;  %536 = vset.pattern.permute.xlu0 %v732_v4  ;;  %v336_v5 = vld [vmem:[%s828_s6] sm:$0x3]  ;;  %v303_v10 = vld [vmem:[#allocation9] sm:$0xf]  ;;  %v317_v12 = vld [vmem:[#allocation11] sm:$0xf] }
  0x24   :  { %210 = vmatpush.bf16.msra.mxu2 %v490_v21  ;;  %223 = vmatpush.bf16.msra.mxu3 %v494_v23  ;;  %v305_v17 = vperm.slane %v303_v10, 0  ;;  %v306_v18 = vperm.slane %v303_v10, 1  ;;  %v319_v19 = vperm.slane %v317_v12, 0  ;;  %v307_v20 = vperm.slane %v303_v10, 2  ;;  %s733_s6 = smov [#allocation14]   ;;  %s466_s9 = sshll.u32 %s829_s7, 4  ;;  %s467_s9 = int_to_ptr.hbm [resolvable:$true] %s466_s9 }
  0x25   :  { %511 = vmatmul.msk.bf16.vlgmr.msra.gmra.mxu0 %vm173_vm0, %v124_v24  ;;  %339 = vperm.xlu1 %535, %v336_v5   ;;  %v308_v22 = vperm.slane %v303_v10, 3  ;;  %v321_v25 = vperm.slane %v317_v12, 2  ;;  %s464_s29 = sshll.u32 %s733_s6, 4  ;;  %vm457_vm10 = vcmask 58368   ;;  %s465_s29 = int_to_ptr.vmem [resolvable:$true] %s464_s29 }
  0x26   :  { %512 = vmatmul.msk.bf16.vlgmr.msra.gmra.mxu1 %vm173_vm0, %v124_v24 }
  0x27   :  { %513 = vmatmul.msk.bf16.vlgmr.msra.gmra.mxu2 %vm173_vm0, %v124_v24  ;;  %514 = vmatmul.msk.bf16.vlgmr.msra.gmra.mxu3 %vm173_vm0, %v124_v24  ;;  %v538_v53 = vpop.eup %537  ;;  %v320_v24 = vperm.slane %v317_v12, 1 }
  0x28   :  { %v264_v54 = vmul.f32 512.0, %v538_v53  ;;  %vm268_vm1 = vweird.f32 %v538_v53 }
  0x2a   :  { %v265_v55 = vsub.f32 1.0, %v264_v54 }
  0x2c   :  { %v266_v56 = vmul.f32 %v538_v53, %v265_v55 }
  0x2e   :  { %v267_v57 = vadd.f32 %v538_v53, %v266_v56 }
  0x30   :  { %v269_v59 = vsel %vm268_vm1, %v538_v53, %v267_v57 }
  0xa2   :  { %v186_v28 = vpop.f32.mrf.mxu0 }
  0xa3   :  { %v199_v29 = vpop.f32.mrf.mxu1  ;;  %v792_v30 = vadd.f32 %v246_v26, %v186_v28  ;;  %v322_v26 = vperm.slane %v317_v12, 3 }
  0xa4   :  { %v794_v31 = vadd.f32 %v247_v27, %v199_v29 }
  0xa5   :  { %v271_v36 = vmul.f32 %v792_v30, %v792_v30 }
  0xa6   :  { %v258_v34 = vadd.f32 %v794_v31, %v792_v30  ;;  %v272_v37 = vmul.f32 %v794_v31, %v794_v31 }
  0xa8   :  { %v275_v46 = vadd.f32 %v272_v37, %v271_v36 }
  0xaa   :  { %v212_v35 = vpop.f32.mrf.mxu2  ;;  %v225_v39 = vpop.f32.mrf.mxu3 }
  0xab   :  { %v802_v38 = vadd.f32 %v248_v32, %v212_v35  ;;  %v188_v40 = vpop.f32.mrf.mxu0  ;;  %v804_v41 = vadd.f32 %v249_v33, %v225_v39  ;;  %v201_v42 = vpop.f32.mrf.mxu1 }
  0xad   :  { %v259_v43 = vadd.f32 %v258_v34, %v802_v38  ;;  %v273_v44 = vmul.f32 %v802_v38, %v802_v38  ;;  %v274_v49 = vmul.f32 %v804_v41, %v804_v41 }
  0xaf   :  { %v260_v45 = vadd.f32 %v259_v43, %v804_v41  ;;  %v276_v50 = vadd.f32 %v275_v46, %v273_v44  ;;  %v344_v43 = vld.sshfl [vmem:[#allocation1] sm:$0xff pattern:$0x73625140]  ;;  %v345_v44 = vld.sshfl [vmem:[#allocation1 + $0x8] sm:$0xff pattern:$0x73625140] }
  0xb0   :  { %v347_v46 = vld.sshfl [vmem:[#allocation1 + $0x18] sm:$0xff pattern:$0x73625140] }
  0xb1   :  { %261 = vadd.xlane.f32.xlu0 %v260_v45  ;;  %v277_v51 = vadd.f32 %v276_v50, %v274_v49  ;;  %v346_v45 = vld.sshfl [vmem:[#allocation1 + $0x10] sm:$0xff pattern:$0x73625140] }
  0xb2   :  { %v214_v47 = vpop.f32.mrf.mxu2  ;;  %v227_v48 = vpop.f32.mrf.mxu3 }
  0xb3   :  { %v340_v47 = vpop.permute.xlu1 %339 }
  0xb9   :  { %278 = vadd.xlane.f32.xlu0 %v277_v51 }
 0x124   :  { %v262_v58 = vpop.xlane.xlu0 %261 }
 0x125   :  { %v270_v60 = vmul.f32 %v269_v59, %v262_v58 }
 0x127   :  { %v281_v63 = vmul.f32 %v270_v60, %v270_v60  ;;  %v284_v13 = vsub.f32 %v792_v30, %v270_v60  ;;  %v285_v14 = vsub.f32 %v794_v31, %v270_v60  ;;  %v286_v15 = vsub.f32 %v802_v38, %v270_v60 }
 0x128   :  { %v287_v21 = vsub.f32 %v804_v41, %v270_v60 }
 0x12c   :  { %v279_v62 = vpop.xlane.xlu0 %278 }
 0x12d   :  { %v280_v0 = vmul.f32 %v279_v62, %v269_v59 }
 0x12f   :  { %v282_v1 = vsub.f32 %v280_v0, %v281_v63  ;;  %v453_v63 = vlaneseq }
 0x131   :  { %v283_v2 = vmax.f32 %v282_v1, 0.0  ;;  %v454_v4 = vshrl.u32 %v453_v63, 7 }
 0x133   :  { %v288_v3 = vadd.f32 1e-05, %v283_v2  ;;  %vm455_vm9 = vcmp.eq.s32.totalorder %v454_v4, 1 }
 0x135   :  { %539 = vrsqrt.f32 %v288_v3  ;;  %vm295_vm3 = vweird.f32 %v288_v3 }
 0x13b   :  { %v540_v6 = vpop.eup %539 }
 0x13c   :  { %v290_v7 = vmul.f32 %v540_v6, %v288_v3  ;;  %vm296_vm2 = vweird.f32 %v540_v6 }
 0x13d   :  { %vm297_vm4 = vmor %vm295_vm3, %vm296_vm2 }
 0x13e   :  { %v291_v8 = vmul.f32 %v540_v6, %v290_v7 }
 0x140   :  { %v292_v9 = vmul.f32 0.5, %v291_v8 }
 0x142   :  { %v293_v11 = vsub.f32 1.5, %v292_v9 }
 0x144   :  { %v294_v16 = vmul.f32 %v540_v6, %v293_v11 }
 0x146   :  { %v298_v23 = vsel %vm297_vm4, %v540_v6, %v294_v16 }
 0x147   :  { %v299_v27 = vmul.f32 %v298_v23, %v284_v13  ;;  %v300_v28 = vmul.f32 %v298_v23, %v285_v14  ;;  %v301_v29 = vmul.f32 %v298_v23, %v286_v15  ;;  %v302_v30 = vmul.f32 %v298_v23, %v287_v21 }
 0x149   :  { %v313_v31 = vmul.f32 %v305_v17, %v299_v27  ;;  %v314_v32 = vmul.f32 %v306_v18, %v300_v28  ;;  %v315_v33 = vmul.f32 %v307_v20, %v301_v29  ;;  %v316_v34 = vmul.f32 %v308_v22, %v302_v30 }
 0x14b   :  { %v327_v35 = vadd.f32 %v319_v19, %v313_v31  ;;  %v328_v36 = vadd.f32 %v320_v24, %v314_v32  ;;  %v329_v37 = vadd.f32 %v321_v25, %v315_v33  ;;  %v330_v38 = vadd.f32 %v322_v26, %v316_v34 }
 0x14d   :  { %v331_v39 = vmax.f32 %v327_v35, 0.0  ;;  %v332_v40 = vmax.f32 %v328_v36, 0.0  ;;  %v333_v41 = vmax.f32 %v329_v37, 0.0  ;;  %v334_v42 = vmax.f32 %v330_v38, 0.0 }
 0x14f   :  { %367 = vmatpush.xpose.msrb.mxu0 %v331_v39  ;;  %387 = vmatpush.xpose.msrb.mxu1 %v332_v40 }
 0x150   :  { %407 = vmatpush.xpose.msrb.mxu2 %v333_v41  ;;  %427 = vmatpush.xpose.msrb.mxu3 %v334_v42 }
 0x152   :  { %368 = vmatmul.f32.vlgmr.msrb.gmra.mxu0 %v344_v43  ;;  %388 = vmatmul.f32.vlgmr.msrb.gmra.mxu1 %v345_v44 }
 0x153   :  { %408 = vmatmul.f32.vlgmr.msrb.gmra.mxu2 %v346_v45  ;;  %428 = vmatmul.f32.vlgmr.msrb.gmra.mxu3 %v347_v46 }
 0x1cf   :  { %v369_v48 = vpop.f32.mrf.mxu0  ;;  %v389_v50 = vpop.f32.mrf.mxu1 }
 0x1d0   :  { %v370_v49 = vadd.f32 %v369_v48, %v340_v47 }
 0x1d2   :  { %v390_v51 = vadd.f32 %v389_v50, %v370_v49 }
 0x1d6   :  { %v409_v52 = vpop.f32.mrf.mxu2  ;;  %v429_v53 = vpop.f32.mrf.mxu3 }
 0x1d7   :  { %v410_v54 = vadd.f32 %v409_v52, %v390_v51 }
 0x1d9   :  { %v430_v55 = vadd.f32 %v429_v53, %v410_v54 }
 0x1db   :  { %v515_v56 = vmul.f32 -1.442695, %v430_v55 }
 0x1dd   :  { %541 = vpow2.f32 %v515_v56 }
 0x1e3   :  { %v542_v57 = vpop.eup %541 }
 0x1e4   :  { %v435_v58 = vadd.f32 1.0, %v542_v57 }
 0x1e6   :  { %543 = vrcp.f32 %v435_v58  ;;  %v447_v62 = vand.u32 2147483648, %v435_v58  ;;  %v445_v1 = vand.u32 2147483647, %v435_v58  ;;  %vm441_vm6 = vweird.f32 %v435_v58 }
 0x1e8   :  { %v448_v3 = vor.u32 1.1754944e-38, %v447_v62  ;;  %vm446_vm8 = vcmp.eq.f32.partialorder %v445_v1, 8.507059e+37 }
 0x1ec   :  { %v544_v59 = vpop.eup %543 }
 0x1ed   :  { %v437_v60 = vmul.f32 %v544_v59, %v435_v58  ;;  %vm442_vm5 = vweird.f32 %v544_v59 }
 0x1ee   :  { %vm443_vm7 = vmor %vm441_vm6, %vm442_vm5 }
 0x1ef   :  { %v438_v61 = vsub.f32 1.0, %v437_v60 }
 0x1f1   :  { %v439_v0 = vmul.f32 %v544_v59, %v438_v61 }
 0x1f3   :  { %v440_v2 = vadd.f32 %v544_v59, %v439_v0 }
 0x1f5   :  { %v444_v5 = vsel %vm443_vm7, %v544_v59, %v440_v2 }
 0x1f6   :  { %v449_v6 = vsel %vm446_vm8, %v448_v3, %v444_v5 }
 0x1f7   :  { %v451_v7 = vmul.f32 0.9999, %v449_v6 }
 0x1f9   :  { %v452_v8 = vadd.f32 0.0001, %v451_v7 }
 0x1fb   :  { %v456_v9 = vsel %vm455_vm9, %v452_v8, %v430_v55 }
 0x1fc   :  { %458 = vst.msk [vmem:[#allocation14] sm:$0x3] %vm457_vm10, %v456_v9 }
 0x1fd   :  { %469 = dma.vmem_to_hbm [thread:$0]  %s465_s29, 32, %s467_s9, [#allocation5]  }
 0x1fe   :  { %721 = dma.done.wait [#allocation5], 32  }
 0x1ff   :  { %722 = vsyncadd [#allocation5], 4294967264 }
 0x200   :  { %474 = vsyncpa [#allocation4], 1 }
 0x201   :  { %475 = vsyncpa [#allocation7], 1 }
 0x202   :  { %476 = vsyncpa [#allocation10], 1 }
 0x203   :  { %477 = vsyncpa [#allocation13], 1 }
 0x204   :  { %478 = vsyncpa [#allocation5], 1 }

</bundles_post_ra>
